<compile_context>
chip_gen: v6e
topology: v6e:2x2x1
jax: 0.10.0
libtpu: 0.0.40
codegen_flags: <defaults>
</compile_context>

<pallas_src>
import functools

import numpy as np
import jax
import jax.numpy as jnp
from jax import lax
from jax.experimental import pallas as pl
from jax.experimental.pallas import tpu as pltpu


def _phase_loss_kernel(inp_ref, tgt_ref, sel_ref, out_ref, *, batch: int,
                       block_rows: int, mse: bool):
    """One grid step: a (TB, F) block of flattened batch rows.

    sel_ref is the resident (F, S_pad) one-hot state-selector matrix; the
    MXU matmul against it produces per-(row, state) sums.  Rows past `batch`
    (ragged last block) are masked out before the final reduce, so any
    garbage/NaN in the padded block region never reaches the result.
    """
    x = inp_ref[...].astype(jnp.float32)          # (TB, F)
    t = tgt_ref[...].astype(jnp.float32)          # (TB, F)
    sel = sel_ref[...]                            # (F, S_pad) f32, resident

    tb = x.shape[0]
    row = lax.broadcasted_iota(jnp.int32, (tb, 1), 0) + pl.program_id(0) * block_rows
    valid = row < batch                           # (TB, 1) mask for ragged block

    if mse:
        # min(S(t+x)^2, S(t-x)^2) = S(t^2 + x^2) - 2*|S(t*x)|
        ssq = jnp.dot(t * t + x * x, sel,
                      preferred_element_type=jnp.float32,
                      precision=lax.Precision.HIGHEST)          # (TB, S_pad)
        scr = jnp.dot(t * x, sel,
                      preferred_element_type=jnp.float32,
                      precision=lax.Precision.HIGHEST)          # (TB, S_pad)
        contrib = ssq - 2.0 * jnp.abs(scr)
    else:
        pos = jnp.dot(jnp.abs(t + x), sel,
                      preferred_element_type=jnp.float32,
                      precision=lax.Precision.HIGHEST)
        neg = jnp.dot(jnp.abs(t - x), sel,
                      preferred_element_type=jnp.float32,
                      precision=lax.Precision.HIGHEST)
        contrib = jnp.minimum(pos, neg)

    # Padded selector columns are all-zero -> contribute exactly 0, so we can
    # reduce the whole (TB, S_pad) tile in a single pass.
    contrib = jnp.where(valid, contrib, 0.0)
    out_ref[...] = jnp.sum(contrib, axis=(0, 1), keepdims=True)  # (1, 1)


def _chip_info():
    """(physical VMEM bytes, per-input tile target bytes), generation aware."""
    try:
        info = pltpu.get_tpu_info()
        phys = int(getattr(info, "vmem_capacity_bytes", 64 << 20))
    except Exception:  # pragma: no cover - defensive
        phys = 64 << 20          # conservative (v7x-sized) fallback
    try:
        kind = jax.devices()[0].device_kind.lower()
    except Exception:  # pragma: no cover - defensive
        kind = ""
    # v6e/v7x: 32 MiB scoped default + fast HBM -> larger tiles pay off.
    tile_target = (4 << 20) if ("v6" in kind or "v7" in kind) else (2 << 20)
    return phys, tile_target


def phase_loss_atomistic(inputs: jax.Array,
                         targets: jax.Array,
                         *,
                         atoms: int,
                         mse: bool = True,
                         block_batch: int | None = None) -> jax.Array:
    """Pallas TPU implementation of PhaseLossAtomistic.forward.

    inputs, targets: (N, S, D) with N divisible by `atoms`.
    Returns sum_{b,s} min(sum_{a,d}(t+x)^2, sum_{a,d}(t-x)^2) / numel(targets)
    (square -> abs when mse=False).
    """
    assert inputs.shape == targets.shape
    n, s, d = targets.shape
    assert n % atoms == 0
    batch = n // atoms
    f = atoms * s * d

    # Lane-dense 2D layout: (batch, atoms*S*D).  Contiguous reshape, no dtype
    # copy (narrow activations are widened to f32 inside the kernel).
    x2 = inputs.reshape(batch, f)
    t2 = targets.reshape(batch, f)
    in_itemsize = jnp.dtype(x2.dtype).itemsize

    # One-hot state selector (F, S_pad): lane l belongs to state (l%(S*D))//D.
    # Columns padded to 128 for a lane-dense MXU output; padded columns are
    # all-zero and contribute 0 to the loss.
    sd = s * d
    s_pad = max(128, ((s + 127) // 128) * 128)
    lane = np.arange(f)
    sel_np = np.zeros((f, s_pad), dtype=np.float32)
    sel_np[lane, (lane % sd) // d] = 1.0
    sel = jnp.asarray(sel_np)
    sel_bytes = f * s_pad * 4

    phys_vmem, tile_target = _chip_info()
    row_bytes = f * in_itemsize
    sub = {4: 8, 2: 16, 1: 32}.get(in_itemsize, 8)   # sublane alignment

    if block_batch is None:
        tb = max(1, tile_target // max(row_bytes, 1))
    else:
        tb = int(block_batch)

    # Ensure >= 2 grid steps for moderate batches so both TensorCores get work
    # on v7x (harmless on single-TC v5e/v6e).
    if batch >= 2 * sub:
        half = -(-batch // 2)
        tb = min(tb, ((half + sub - 1) // sub) * sub)

    def vmem_needed(tb_):
        # ~6 full f32 blocks live at peak (2 inputs x 2 pipeline buffers +
        # the two MXU LHS temporaries), resident selector (x2 buffers), slack.
        return 6 * tb_ * f * 4 + 2 * sel_bytes + (2 << 20)

    budget = phys_vmem // 2
    while tb > sub and vmem_needed(min(tb, batch)) > budget:
        tb = max(sub, ((tb // 2) // sub) * sub)

    if tb >= batch:
        tb = batch                       # single block covers the batch dim
    else:
        tb = max(sub, (tb // sub) * sub)  # sublane-aligned tile

    grid_b = -(-batch // tb)             # cdiv; ragged last block masked in-kernel

    needed = vmem_needed(tb)
    vmem_limit = None
    if needed > (12 << 20):
        # Clamp well below physical VMEM (v7x has only 64 MiB per TC).
        vmem_limit = min(needed + (8 << 20), phys_vmem * 3 // 4)

    kernel = functools.partial(_phase_loss_kernel, batch=batch, block_rows=tb,
                               mse=mse)

    partials = pl.pallas_call(
        kernel,
        out_shape=jax.ShapeDtypeStruct((grid_b, 1), jnp.float32),
        grid_spec=pltpu.PrefetchScalarGridSpec(
            num_scalar_prefetch=0,
            grid=(grid_b,),
            in_specs=[
                pl.BlockSpec((tb, f), lambda b: (b, 0)),
                pl.BlockSpec((tb, f), lambda b: (b, 0)),
                pl.BlockSpec((f, s_pad), lambda b: (0, 0)),   # resident selector
            ],
            out_specs=pl.BlockSpec((1, 1), lambda b: (b, 0)),
        ),
        compiler_params=pltpu.CompilerParams(
            dimension_semantics=("parallel",),   # independent per-block partials
            vmem_limit_bytes=vmem_limit,
        ),
    )(x2, t2, sel)

    numel = jnp.float32(n * s * d)
    return jnp.sum(partials) / numel


def _reference(inputs, targets, *, atoms, mse=True):
    n, s, d = targets.shape
    batch = n // atoms
    x = inputs.reshape(batch, atoms, s, d).astype(jnp.float32)
    t = targets.reshape(batch, atoms, s, d).astype(jnp.float32)
    if mse:
        pos = jnp.sum(jnp.square(t + x), axis=(1, 3))
        neg = jnp.sum(jnp.square(t - x), axis=(1, 3))
    else:
        pos = jnp.sum(jnp.abs(t + x), axis=(1, 3))
        neg = jnp.sum(jnp.abs(t - x), axis=(1, 3))
    res = jnp.minimum(pos, neg)
    return jnp.sum(res) / (n * s * d)


if __name__ == "__main__":
    key = jax.random.PRNGKey(0)
    ok = True

    # Case 1: small shapes (batch=2 molecules, atoms=4, S=3 states, D=3) ->
    # single-block path, block = full array.
    atoms, batch, S, D = 4, 2, 3, 3
    k1, k2 = jax.random.split(key)
    inp = jax.random.normal(k1, (batch * atoms, S, D), dtype=jnp.float32)
    tgt = jax.random.normal(k2, (batch * atoms, S, D), dtype=jnp.float32)
    for mse in (True, False):
        out = jax.block_until_ready(
            phase_loss_atomistic(inp, tgt, atoms=atoms, mse=mse))
        ref = jax.block_until_ready(
            _reference(inp, tgt, atoms=atoms, mse=mse))
        ok &= bool(jnp.allclose(out, ref, rtol=1e-5, atol=1e-5))

    # Case 2: multi-block grid with a ragged (in-kernel masked) last block —
    # exercises the parallel grid axis, per-block partials, and row masking.
    atoms, batch, S, D = 5, 20, 3, 3
    k3, k4 = jax.random.split(k1)
    inp = jax.random.normal(k3, (batch * atoms, S, D), dtype=jnp.float32)
    tgt = jax.random.normal(k4, (batch * atoms, S, D), dtype=jnp.float32)
    for mse in (True, False):
        out = jax.block_until_ready(
            phase_loss_atomistic(inp, tgt, atoms=atoms, mse=mse, block_batch=8))
        ref = jax.block_until_ready(
            _reference(inp, tgt, atoms=atoms, mse=mse))
        ok &= bool(jnp.allclose(out, ref, rtol=1e-5, atol=1e-5))

    print("KERNEL_OK" if ok else "KERNEL_MISMATCH")
</pallas_src>

<mosaic_0001>
module attributes {stable_mosaic.version = 11 : i64} {
  func.func @_phase_loss_kernel(%arg0: i32, %arg1: memref<2x36xf32, #tpu.memory_space<vmem>>, %arg2: memref<2x36xf32, #tpu.memory_space<vmem>>, %arg3: memref<36x128xf32, #tpu.memory_space<vmem>>, %arg4: memref<1x1xf32, #tpu.memory_space<vmem>>) attributes {dimension_semantics = [#tpu.dimension_semantics<parallel>], iteration_bounds = array<i64: 1>, scalar_prefetch = 0 : i64, scratch_operands = 0 : i64, tpu.core_type = #tpu.core_type<tc>, window_params = [{transform_indices = @transform_0, window_bounds = array<i64: 2, 36>}, {transform_indices = @transform_1, window_bounds = array<i64: 2, 36>}, {pipeline_mode = #tpu.pipeline_mode<synchronous>, transform_indices = @transform_2, window_bounds = array<i64: 36, 128>}, {transform_indices = @transform_3, window_bounds = array<i64: 1, 1>}]} {
    %c0 = arith.constant 0 : index
    %c0_0 = arith.constant 0 : index
    %0 = vector.load %arg1[%c0, %c0_0] : memref<2x36xf32, #tpu.memory_space<vmem>>, vector<2x36xf32>
    %c0_1 = arith.constant 0 : index
    %c0_2 = arith.constant 0 : index
    %1 = vector.load %arg2[%c0_1, %c0_2] : memref<2x36xf32, #tpu.memory_space<vmem>>, vector<2x36xf32>
    %c0_3 = arith.constant 0 : index
    %c0_4 = arith.constant 0 : index
    %2 = vector.load %arg3[%c0_3, %c0_4] : memref<36x128xf32, #tpu.memory_space<vmem>>, vector<36x128xf32>
    %3 = tpu.iota {dimensions = array<i32: 0>} : vector<2x1xi32>
    %c2_i32 = arith.constant 2 : i32
    %4 = arith.muli %arg0, %c2_i32 : i32
    %5 = vector.broadcast %4 : i32 to vector<2x1xi32>
    %6 = arith.addi %3, %5 : vector<2x1xi32>
    %c2_i32_5 = arith.constant 2 : i32
    %7 = vector.broadcast %c2_i32_5 : i32 to vector<2x1xi32>
    %8 = arith.cmpi slt, %6, %7 : vector<2x1xi32>
    %9 = arith.mulf %1, %1 : vector<2x36xf32>
    %10 = arith.mulf %0, %0 : vector<2x36xf32>
    %11 = arith.addf %9, %10 : vector<2x36xf32>
    %cst = arith.constant dense<0.000000e+00> : vector<2x128xf32>
    %12 = tpu.matmul %11, %2, %cst {dimension_numbers = #tpu.dot_dimension_numbers<[1], [0], [0], [1], [0, 0, 1, 1], [], []>, precision = #tpu.contract_precision<fp32>} : vector<2x36xf32>, vector<36x128xf32>, vector<2x128xf32> -> vector<2x128xf32>
    %13 = arith.mulf %1, %0 : vector<2x36xf32>
    %cst_6 = arith.constant dense<0.000000e+00> : vector<2x128xf32>
    %14 = tpu.matmul %13, %2, %cst_6 {dimension_numbers = #tpu.dot_dimension_numbers<[1], [0], [0], [1], [0, 0, 1, 1], [], []>, precision = #tpu.contract_precision<fp32>} : vector<2x36xf32>, vector<36x128xf32>, vector<2x128xf32> -> vector<2x128xf32>
    %15 = math.absf %14 : vector<2x128xf32>
    %cst_7 = arith.constant 2.000000e+00 : f32
    %16 = vector.broadcast %cst_7 : f32 to vector<2x128xf32>
    %17 = arith.mulf %16, %15 : vector<2x128xf32>
    %18 = arith.subf %12, %17 : vector<2x128xf32>
    %cst_8 = arith.constant 0.000000e+00 : f32
    %19 = vector.shape_cast %8 : vector<2x1xi1> to vector<2x1xi1>
    %20 = vector.broadcast %19 : vector<2x1xi1> to vector<2x128xi1>
    %21 = vector.broadcast %cst_8 : f32 to vector<2x128xf32>
    %22 = arith.select %20, %18, %21 : vector<2x128xi1>, vector<2x128xf32>
    %23 = vector.shape_cast %22 : vector<2x128xf32> to vector<1x2x128xf32>
    %cst_9 = arith.constant dense<0.000000e+00> : vector<1xf32>
    %24 = vector.multi_reduction <add>, %23, %cst_9 [1, 2] : vector<1x2x128xf32> to vector<1xf32>
    %25 = vector.shape_cast %24 : vector<1xf32> to vector<1x1x1xf32>
    %26 = vector.extract %25[0, 0, 0] : f32 from vector<1x1x1xf32>
    %27 = vector.broadcast %26 : f32 to vector<1x1xf32>
    %c0_10 = arith.constant 0 : index
    %c0_11 = arith.constant 0 : index
    %28 = vector.load %arg4[%c0_10, %c0_11] : memref<1x1xf32, #tpu.memory_space<vmem>>, vector<1x1xf32>
    tpu.vector_store %arg4[%c0_10, %c0_11], %27 {strides = array<i32>} : memref<1x1xf32, #tpu.memory_space<vmem>>, vector<1x1xf32>,
    return
  }
  func.func @transform_0(%arg0: i32) -> (i32, i32) {
    %c0_i32 = arith.constant 0 : i32
    %c0_i32_0 = arith.constant 0 : i32
    return %arg0, %c0_i32 : i32, i32
  }
  func.func @transform_1(%arg0: i32) -> (i32, i32) {
    %c0_i32 = arith.constant 0 : i32
    %c0_i32_0 = arith.constant 0 : i32
    return %arg0, %c0_i32 : i32, i32
  }
  func.func @transform_2(%arg0: i32) -> (i32, i32) {
    %c0_i32 = arith.constant 0 : i32
    %c0_i32_0 = arith.constant 0 : i32
    %c0_i32_1 = arith.constant 0 : i32
    return %c0_i32, %c0_i32_0 : i32, i32
  }
  func.func @transform_3(%arg0: i32) -> (i32, i32) {
    %c0_i32 = arith.constant 0 : i32
    %c0_i32_0 = arith.constant 0 : i32
    return %arg0, %c0_i32 : i32, i32
  }
}

</mosaic_0001>

<bundles_post_ra>
// kernel: tpu_custom_call.1
= control target key start
LH: loop header
LB: loop body
LE: loop exit
PB: predicated region body
PF: predicated region fallthrough
CT: control target
= control target key end

     0   :  { %8 = vsyncpa [#allocation3], 0  ;;  %s1704_s0 = inlined_call_operand.hbm [shape: f32[2,36], index: 0, kind: input, shape index: {}]   ;;  %s1705_s1 = inlined_call_operand.hbm [shape: f32[2,36], index: 1, kind: input, shape index: {}]   ;;  %s1706_s2 = inlined_call_operand.hbm [shape: f32[36,128], index: 2, kind: input, shape index: {}]   ;;  %s1707_s3 = inlined_call_operand.hbm [shape: f32[1,1], index: 3, kind: output, shape index: {}]  }
   0x1   :  { %9 = vsyncpa [#allocation6], 0 }
   0x2   :  { %10 = vsyncpa [#allocation4], 0  ;;  %s1436_s12 = smov [#allocation5]   ;;  %s1437_s14 = smov [#allocation2]  }
   0x3   :  { %s27_s13 = sshll.u32 %s1436_s12, 4  ;;  %s17_s15 = sshll.u32 %s1437_s14, 4  ;;  %s28_s13 = int_to_ptr.vmem [resolvable:$true] %s27_s13  ;;  %s18_s15 = int_to_ptr.vmem [resolvable:$true] %s17_s15 }
   0x4   :  { %s1358_s16 = scalar_lea.vmem %s28_s13, 32  ;;  %p1363_p1 = scmp.lt.s32.totalorder %s28_s13, %s28_s13 }
   0x5   :  { %p1359_p0 = scmp.ne.s32.totalorder %s28_s13, %s1358_s16  ;;  %p1364_p2 = scmp.lt.s32.totalorder %s1358_s16, %s1358_s16 }
   0x7   :  { %p1365_p3 = por %p1364_p2, %p1363_p1 }
   0x9   :  { %p1366_p4 = pnand %p1365_p3, %p1359_p0 }
   0xb   :  { %1369 = shalt.err (!%p1366_p4)
}
   0xc   :  { %30 = dma.hbm_to_vmem [thread:$0]  %s1705_s1, 32, %s28_s13, [#allocation6]  }
   0xd   :  { %s1378_s19 = scalar_lea.vmem %s18_s15, 32  ;;  %p1383_p6 = scmp.lt.s32.totalorder %s18_s15, %s18_s15 }
   0xe   :  { %p1379_p5 = scmp.ne.s32.totalorder %s18_s15, %s1378_s19  ;;  %p1384_p7 = scmp.lt.s32.totalorder %s1378_s19, %s1378_s19 }
  0x10   :  { %p1385_p8 = por %p1384_p7, %p1383_p6 }
  0x12   :  { %p1386_p9 = pnand %p1385_p8, %p1379_p5 }
  0x14   :  { %1389 = shalt.err (!%p1386_p9)
}
  0x15   :  { %20 = dma.hbm_to_vmem [thread:$0]  %s1704_s0, 32, %s18_s15, [#allocation3]  }
  0x16   :  { %s1438_s22 = smov [#allocation7]  }
  0x17   :  { %s36_s23 = sshll.u32 %s1438_s22, 4  ;;  %s37_s23 = int_to_ptr.vmem [resolvable:$true] %s36_s23 }
  0x18   :  { %s1398_s24 = scalar_lea.vmem %s37_s23, 640  ;;  %p1403_p11 = scmp.lt.s32.totalorder %s37_s23, %s37_s23 }
  0x19   :  { %p1399_p10 = scmp.ne.s32.totalorder %s37_s23, %s1398_s24  ;;  %p1404_p12 = scmp.lt.s32.totalorder %s1398_s24, %s1398_s24 }
  0x1b   :  { %p1405_p13 = por %p1404_p12, %p1403_p11 }
  0x1d   :  { %p1406_p0 = pnand %p1405_p13, %p1399_p10 }
  0x1f   :  { %1409 = shalt.err (!%p1406_p0)
}
  0x20   :  { %s1439_s1 = smov 128   ;;  %s1440_s25 = smov 8  }
  0x21   :  { %42 = dma.hbm_to_vmem [thread:$0]  %s1706_s2, 640, %s37_s23, [#allocation6], %s1439_s1, %s1439_s1, %s1440_s25  }
  0x22   :  { %1430 = dma.done.wait [#allocation3], 32  }
  0x23   :  { %1431 = vsyncadd [#allocation3], 4294967264 }
  0x24   :  { %1432 = dma.done.wait [#allocation6], 672  }
  0x25   :  { %1433 = vsyncadd [#allocation6], 4294966624  ;;  %v1441_v0 = vmov 0.0   ;;  %vm1442_vm0 = vmmov 0   ;;  %vm72_vm1 = vcmask 1043456   ;;  %v57_v2 = vld [vmem:[#allocation7 + $0x18] sm:$0xff] }
  0x26   :  { %1184 = vmatprep.subr.mxu0 %v1441_v0  ;;  %1197 = vmatprep.subr.mxu1 %v1441_v0  ;;  %v58_v1 = vld [vmem:[#allocation7 + $0x20] sm:$0xf]  ;;  %v56_v3 = vld [vmem:[#allocation7 + $0x10] sm:$0xff]  ;;  %v1479_v5 = vand.u32 4294901760, %v57_v2  ;;  %v55_v7 = vld [vmem:[#allocation7 + $0x8] sm:$0xff]  ;;  %vm68_vm2 = vcmask 293888  }
  0x27   :  { %1194 = vmatprep.mubr.msk.f32.mxu0 %vm1442_vm0, %v1441_v0  ;;  %1207 = vmatprep.mubr.msk.f32.mxu1 %vm1442_vm0, %v1441_v0  ;;  %v74_v4 = vsel %vm72_vm1, %v58_v1, 0  ;;  %v1481_v6 = vand.u32 4294901760, %v56_v3  ;;  %v54_v8 = vld [vmem:[#allocation7] sm:$0xff]  ;;  %v1485_v10 = vand.u32 4294901760, %v55_v7  ;;  %v1489_v12 = vld [vmem:[#allocation2] sm:$0x3] }
  0x28   :  { %v1483_v9 = vand.u32 4294901760, %v74_v4  ;;  %v1487_v11 = vand.u32 4294901760, %v54_v8  ;;  %v1492_v13 = vsub.f32 %v57_v2, %v1479_v5  ;;  %v53_v14 = vld [vmem:[#allocation5] sm:$0x3]  ;;  %v66_v15 = vmul.f32 %v1489_v12, %v1489_v12  ;;  %s1443_s0 = smov [#allocation8]  }
  0x29   :  { %v1497_v16 = vsub.f32 %v56_v3, %v1481_v6  ;;  %v65_v18 = vmul.f32 %v53_v14, %v53_v14  ;;  %v1504_v19 = vsub.f32 %v55_v7, %v1485_v10  ;;  %v574_v43 = vmul.f32 %v53_v14, %v1489_v12  ;;  %s1102_s2 = sshll.u32 %s1443_s0, 4  ;;  %s1103_s2 = int_to_ptr.vmem [resolvable:$true] %s1102_s2 }
  0x2a   :  { %1185 = vmatpush3.msra.mxu0 %v1483_v9  ;;  %v1501_v17 = vsub.f32 %v74_v4, %v1483_v9  ;;  %v1508_v20 = vand.u32 4294901760, %v1492_v13  ;;  %v1514_v22 = vsub.f32 %v54_v8, %v1487_v11  ;;  %v59_v12 = vlaneseq  ;;  %s1410_s29 = scalar_lea.vmem %s1103_s2, 16  ;;  %s1414_s30 = scalar_lea.vmem %s1103_s2, 32 }
  0x2b   :  { %1186 = vmatprep.subr.mxu0 %v1441_v0  ;;  %v1511_v21 = vand.u32 4294901760, %v1497_v16  ;;  %v67_v24 = vadd.f32 %v66_v15, %v65_v18  ;;  %v1521_v25 = vand.u32 4294901760, %v1504_v19  ;;  %v576_v44 = vsel %vm68_vm2, %v574_v43, 0  ;;  %p1411_p1 = scmp.ne.s32.totalorder %s1103_s2, %s1410_s29  ;;  %p1415_p2 = scmp.lt.s32.totalorder %s1103_s2, %s1103_s2 }
  0x2c   :  { %1187 = vmatpush3.msra.mxu0 %v1479_v5  ;;  %v1518_v23 = vand.u32 4294901760, %v1501_v17  ;;  %v189_v26 = vsub.f32 %v1492_v13, %v1508_v20  ;;  %v1533_v30 = vand.u32 4294901760, %v1514_v22  ;;  %v1593_v45 = vand.u32 4294901760, %v576_v44  ;;  %p1416_p3 = scmp.lt.s32.totalorder %s1414_s30, %s1410_s29 }
  0x2d   :  { %1188 = vmatprep.subr.mxu0 %v1441_v0  ;;  %v70_v28 = vsel %vm68_vm2, %v67_v24, 0  ;;  %v196_v29 = vsub.f32 %v1497_v16, %v1511_v21  ;;  %v203_v34 = vsub.f32 %v1504_v19, %v1521_v25  ;;  %vm1082_vm4 = vcmask 1041408  }
  0x2e   :  { %1189 = vmatpush3.msra.mxu0 %v1481_v6  ;;  %v182_v27 = vsub.f32 %v1501_v17, %v1518_v23  ;;  %v1536_v31 = vand.u32 4294901760, %v70_v28  ;;  %v1541_v33 = vand.u32 4294901760, %v189_v26  ;;  %v210_v37 = vsub.f32 %v1514_v22, %v1533_v30  ;;  %p1417_p4 = por %p1416_p3, %p1415_p2 }
  0x2f   :  { %1190 = vmatprep.subr.mxu0 %v1441_v0  ;;  %v1549_v36 = vand.u32 4294901760, %v196_v29  ;;  %v1556_v39 = vand.u32 4294901760, %v203_v34  ;;  %v1606_v46 = vsub.f32 %v576_v44, %v1593_v45  ;;  %vm1094_vm5 = vcmask 0  }
  0x30   :  { %1191 = vmatpush3.msra.mxu0 %v1485_v10  ;;  %v1539_v32 = vand.u32 4294901760, %v182_v27  ;;  %v147_v35 = vsub.f32 %v70_v28, %v1536_v31  ;;  %v1560_v41 = vand.u32 4294901760, %v210_v37  ;;  %p1418_p5 = pnand %p1417_p4, %p1411_p1 }
  0x31   :  { %1192 = vmatprep.subr.mxu0 %v1441_v0  ;;  %v650_v47 = vand.u32 4294901760, %v1606_v46 }
  0x32   :  { %1198 = vmatpush3.msra.mxu1 %v1539_v32  ;;  %1193 = vmatpush3.msra.mxu0 %v1487_v11  ;;  %v148_v38 = vand.u32 4294901760, %v147_v35 }
  0x33   :  { %1199 = vmatprep.subr.mxu1 %v1441_v0  ;;  %1210 = vmatprep.subr.mxu0 %v1441_v0  ;;  %v651_v48 = vsub.f32 %v1606_v46, %v650_v47 }
  0x34   :  { %1200 = vmatpush3.msra.mxu1 %v1541_v33  ;;  %v149_v40 = vsub.f32 %v147_v35, %v148_v38 }
  0x35   :  { %1201 = vmatprep.subr.mxu1 %v1441_v0  ;;  %v652_v49 = vand.u32 4294901760, %v651_v48 }
  0x36   :  { %1202 = vmatpush3.msra.mxu1 %v1549_v36  ;;  %v150_v42 = vand.u32 4294901760, %v149_v40 }
  0x37   :  { %1203 = vmatprep.subr.mxu1 %v1441_v0 }
  0x38   :  { %1204 = vmatpush3.msra.mxu1 %v1556_v39  ;;  %1195 = vmatmul.mubr.f32.vlgmr.msra.gmra.mxu0 %v150_v42 }
  0x39   :  { %1205 = vmatprep.subr.mxu1 %v1441_v0  ;;  %1211 = vmatpush3.msra.mxu0 %v1501_v17 }
  0x3a   :  { %1206 = vmatpush3.msra.mxu1 %v1560_v41  ;;  %1212 = vmatprep.subr.mxu0 %v1441_v0 }
  0x3b   :  { %1208 = vmatmul.mubr.f32.vlgmr.msra.gmra.mxu1 %v1536_v31  ;;  %1213 = vmatpush3.msra.mxu0 %v1492_v13 }
  0x3c   :  { %1223 = vmatprep.subr.mxu1 %v1441_v0  ;;  %1214 = vmatprep.subr.mxu0 %v1441_v0 }
  0x3d   :  { %1224 = vmatpush3.msra.mxu1 %v1483_v9  ;;  %1215 = vmatpush3.msra.mxu0 %v1497_v16 }
  0x3e   :  { %1225 = vmatprep.subr.mxu1 %v1441_v0  ;;  %1216 = vmatprep.subr.mxu0 %v1441_v0 }
  0x3f   :  { %1220 = vmatprep.mubr.msk.f32.mxu0 %vm1442_vm0, %v1441_v0  ;;  %1217 = vmatpush3.msra.mxu0 %v1504_v19 }
  0x40   :  { %1226 = vmatpush3.msra.mxu1 %v1479_v5  ;;  %1218 = vmatprep.subr.mxu0 %v1441_v0 }
  0x41   :  { %1227 = vmatprep.subr.mxu1 %v1441_v0  ;;  %1219 = vmatpush3.msra.mxu0 %v1514_v22 }
  0x42   :  { %1228 = vmatpush3.msra.mxu1 %v1481_v6  ;;  %1221 = vmatmul.mubr.f32.vlgmr.msra.gmra.mxu0 %v147_v35 }
  0x43   :  { %1236 = vmatprep.subr.mxu0 %v1441_v0  ;;  %1229 = vmatprep.subr.mxu1 %v1441_v0 }
  0x44   :  { %1237 = vmatpush3.msra.mxu0 %v1518_v23  ;;  %1230 = vmatpush3.msra.mxu1 %v1485_v10 }
  0x45   :  { %1238 = vmatprep.subr.mxu0 %v1441_v0  ;;  %1231 = vmatprep.subr.mxu1 %v1441_v0 }
  0x46   :  { %1239 = vmatpush3.msra.mxu0 %v1508_v20  ;;  %1232 = vmatpush3.msra.mxu1 %v1487_v11 }
  0x47   :  { %1240 = vmatprep.subr.mxu0 %v1441_v0  ;;  %1233 = vmatprep.mubr.msk.f32.mxu1 %vm1442_vm0, %v1441_v0 }
  0x48   :  { %1241 = vmatpush3.msra.mxu0 %v1511_v21  ;;  %1234 = vmatmul.mubr.f32.vlgmr.msra.gmra.mxu1 %v148_v38 }
  0x49   :  { %1242 = vmatprep.subr.mxu0 %v1441_v0  ;;  %1249 = vmatprep.subr.mxu1 %v1441_v0 }
  0x4a   :  { %1243 = vmatpush3.msra.mxu0 %v1521_v25  ;;  %1250 = vmatpush3.msra.mxu1 %v1483_v9 }
  0x4b   :  { %1244 = vmatprep.subr.mxu0 %v1441_v0  ;;  %1251 = vmatprep.subr.mxu1 %v1441_v0 }
  0x4c   :  { %1245 = vmatpush3.msra.mxu0 %v1533_v30  ;;  %1246 = vmatprep.mubr.msk.f32.mxu0 %vm1442_vm0, %v1441_v0 }
  0x4d   :  { %1252 = vmatpush3.msra.mxu1 %v1479_v5  ;;  %1247 = vmatmul.mubr.f32.vlgmr.msra.gmra.mxu0 %v1536_v31 }
  0x4e   :  { %1253 = vmatprep.subr.mxu1 %v1441_v0  ;;  %1262 = vmatprep.subr.mxu0 %v1441_v0 }
  0x4f   :  { %1254 = vmatpush3.msra.mxu1 %v1481_v6  ;;  %1263 = vmatpush3.msra.mxu0 %v1483_v9 }
  0x50   :  { %1255 = vmatprep.subr.mxu1 %v1441_v0  ;;  %1264 = vmatprep.subr.mxu0 %v1441_v0 }
  0x51   :  { %1256 = vmatpush3.msra.mxu1 %v1485_v10  ;;  %1265 = vmatpush3.msra.mxu0 %v1479_v5 }
  0x52   :  { %1257 = vmatprep.subr.mxu1 %v1441_v0  ;;  %1266 = vmatprep.subr.mxu0 %v1441_v0 }
  0x53   :  { %1258 = vmatpush3.msra.mxu1 %v1487_v11  ;;  %1259 = vmatprep.mubr.msk.f32.mxu1 %vm1442_vm0, %v1441_v0 }
  0x54   :  { %1267 = vmatpush3.msra.mxu0 %v1481_v6  ;;  %1260 = vmatmul.mubr.f32.vlgmr.msra.gmra.mxu1 %v1536_v31 }
  0x55   :  { %1268 = vmatprep.subr.mxu0 %v1441_v0  ;;  %1275 = vmatprep.subr.mxu1 %v1441_v0 }
  0x56   :  { %1269 = vmatpush3.msra.mxu0 %v1485_v10  ;;  %1276 = vmatpush3.msra.mxu1 %v1539_v32 }
  0x57   :  { %1270 = vmatprep.subr.mxu0 %v1441_v0  ;;  %1277 = vmatprep.subr.mxu1 %v1441_v0 }
  0x58   :  { %1271 = vmatpush3.msra.mxu0 %v1487_v11  ;;  %1278 = vmatpush3.msra.mxu1 %v1541_v33 }
  0x59   :  { %1272 = vmatprep.mubr.msk.f32.mxu0 %vm1442_vm0, %v1441_v0  ;;  %1279 = vmatprep.subr.mxu1 %v1441_v0 }
  0x5a   :  { %1288 = vmatprep.subr.mxu0 %v1441_v0  ;;  %1273 = vmatmul.mubr.f32.vlgmr.msra.gmra.mxu0 %v652_v49 }
  0x5b   :  { %1280 = vmatpush3.msra.mxu1 %v1549_v36  ;;  %1289 = vmatpush3.msra.mxu0 %v1501_v17 }
  0x5c   :  { %1281 = vmatprep.subr.mxu1 %v1441_v0  ;;  %1290 = vmatprep.subr.mxu0 %v1441_v0 }
  0x5d   :  { %1282 = vmatpush3.msra.mxu1 %v1556_v39  ;;  %1291 = vmatpush3.msra.mxu0 %v1492_v13 }
  0x5e   :  { %1283 = vmatprep.subr.mxu1 %v1441_v0  ;;  %1292 = vmatprep.subr.mxu0 %v1441_v0 }
  0x5f   :  { %1284 = vmatpush3.msra.mxu1 %v1560_v41  ;;  %1285 = vmatprep.mubr.msk.f32.mxu1 %vm1442_vm0, %v1441_v0 }
  0x60   :  { %1293 = vmatpush3.msra.mxu0 %v1497_v16  ;;  %1286 = vmatmul.mubr.f32.vlgmr.msra.gmra.mxu1 %v1593_v45 }
  0x61   :  { %1294 = vmatprep.subr.mxu0 %v1441_v0  ;;  %1301 = vmatprep.subr.mxu1 %v1441_v0 }
  0x62   :  { %1295 = vmatpush3.msra.mxu0 %v1504_v19  ;;  %1302 = vmatpush3.msra.mxu1 %v1483_v9  ;;  %v60_v19 = vshrl.u32 %v59_v12, 7 }
  0x63   :  { %1296 = vmatprep.subr.mxu0 %v1441_v0  ;;  %1303 = vmatprep.subr.mxu1 %v1441_v0 }
  0x64   :  { %1297 = vmatpush3.msra.mxu0 %v1514_v22  ;;  %1298 = vmatprep.mubr.msk.f32.mxu0 %vm1442_vm0, %v1441_v0  ;;  %vm64_vm3 = vcmp.lt.s32.totalorder %v60_v19, 2 }
  0x65   :  { %1304 = vmatpush3.msra.mxu1 %v1479_v5  ;;  %1299 = vmatmul.mubr.f32.vlgmr.msra.gmra.mxu0 %v1606_v46 }
  0x66   :  { %1305 = vmatprep.subr.mxu1 %v1441_v0  ;;  %1314 = vmatprep.subr.mxu0 %v1441_v0 }
  0x67   :  { %1306 = vmatpush3.msra.mxu1 %v1481_v6  ;;  %1315 = vmatpush3.msra.mxu0 %v1518_v23 }
  0x68   :  { %1307 = vmatprep.subr.mxu1 %v1441_v0  ;;  %1316 = vmatprep.subr.mxu0 %v1441_v0 }
  0x69   :  { %1308 = vmatpush3.msra.mxu1 %v1485_v10  ;;  %1317 = vmatpush3.msra.mxu0 %v1508_v20 }
  0x6a   :  { %1309 = vmatprep.subr.mxu1 %v1441_v0  ;;  %1318 = vmatprep.subr.mxu0 %v1441_v0 }
  0x6b   :  { %1310 = vmatpush3.msra.mxu1 %v1487_v11  ;;  %1311 = vmatprep.mubr.msk.f32.mxu1 %vm1442_vm0, %v1441_v0 }
  0x6c   :  { %1319 = vmatpush3.msra.mxu0 %v1511_v21  ;;  %1312 = vmatmul.mubr.f32.vlgmr.msra.gmra.mxu1 %v650_v47 }
  0x6d   :  { %1320 = vmatprep.subr.mxu0 %v1441_v0  ;;  %1327 = vmatprep.subr.mxu1 %v1441_v0 }
  0x6e   :  { %1321 = vmatpush3.msra.mxu0 %v1521_v25  ;;  %1328 = vmatpush3.msra.mxu1 %v1483_v9 }
  0x6f   :  { %1322 = vmatprep.subr.mxu0 %v1441_v0  ;;  %1329 = vmatprep.subr.mxu1 %v1441_v0 }
  0x70   :  { %1323 = vmatpush3.msra.mxu0 %v1533_v30  ;;  %1324 = vmatprep.mubr.msk.f32.mxu0 %vm1442_vm0, %v1441_v0 }
  0x71   :  { %1330 = vmatpush3.msra.mxu1 %v1479_v5  ;;  %1325 = vmatmul.mubr.f32.vlgmr.msra.gmra.mxu0 %v1593_v45 }
  0x72   :  { %1331 = vmatprep.subr.mxu1 %v1441_v0  ;;  %1337 = vmatprep.mubr.msk.f32.mxu1 %vm1442_vm0, %v1441_v0 }
  0x73   :  { %1332 = vmatpush3.msra.mxu1 %v1481_v6 }
  0x74   :  { %1333 = vmatprep.subr.mxu1 %v1441_v0 }
  0x75   :  { %1334 = vmatpush3.msra.mxu1 %v1485_v10 }
  0x76   :  { %1335 = vmatprep.subr.mxu1 %v1441_v0 }
  0x77   :  { %1336 = vmatpush3.msra.mxu1 %v1487_v11 }
  0x78   :  { %1338 = vmatmul.mubr.f32.vlgmr.msra.gmra.mxu1 %v1593_v45 }
  0xf8   :  { %v152_v50 = vpop.f32.mrf.mxu0 }
  0xfa   :  { %v1196_v51 = vpop.f32.mrf.mxu0 }
  0xfb   :  { %v248_v52 = vpop.f32.mrf.mxu1 }
  0xfc   :  { %v249_v10 = vadd.f32 %v248_v52, %v152_v50 }
  0xfd   :  { %v1209_v53 = vpop.f32.mrf.mxu1 }
 0x102   :  { %v330_v54 = vpop.f32.mrf.mxu0 }
 0x103   :  { %v331_v13 = vadd.f32 %v330_v54, %v249_v10 }
 0x104   :  { %v1222_v55 = vpop.f32.mrf.mxu0 }
 0x108   :  { %v408_v56 = vpop.f32.mrf.mxu1 }
 0x109   :  { %v409_v16 = vadd.f32 %v408_v56, %v331_v13 }
 0x10a   :  { %v1235_v57 = vpop.f32.mrf.mxu1 }
 0x10d   :  { %v494_v58 = vpop.f32.mrf.mxu0 }
 0x10e   :  { %v495_v20 = vadd.f32 %v494_v58, %v409_v16 }
 0x10f   :  { %v1248_v59 = vpop.f32.mrf.mxu0 }
 0x114   :  { %v570_v60 = vpop.f32.mrf.mxu1 }
 0x115   :  { %v571_v22 = vadd.f32 %v570_v60, %v495_v20 }
 0x116   :  { %v1261_v61 = vpop.f32.mrf.mxu1 }
 0x11a   :  { %v654_v62 = vpop.f32.mrf.mxu0 }
 0x11c   :  { %v1274_v63 = vpop.f32.mrf.mxu0 }
 0x120   :  { %v750_v1 = vpop.f32.mrf.mxu1 }
 0x121   :  { %v751_v6 = vadd.f32 %v750_v1, %v654_v62 }
 0x122   :  { %v1287_v0 = vpop.f32.mrf.mxu1 }
 0x125   :  { %v832_v2 = vpop.f32.mrf.mxu0 }
 0x126   :  { %v833_v8 = vadd.f32 %v832_v2, %v751_v6 }
 0x127   :  { %v1300_v3 = vpop.f32.mrf.mxu0 }
 0x12c   :  { %v910_v4 = vpop.f32.mrf.mxu1 }
 0x12d   :  { %v911_v11 = vadd.f32 %v910_v4, %v833_v8 }
 0x12e   :  { %v1313_v5 = vpop.f32.mrf.mxu1 }
 0x131   :  { %v996_v7 = vpop.f32.mrf.mxu0 }
 0x132   :  { %v997_v14 = vadd.f32 %v996_v7, %v911_v11 }
 0x133   :  { %v1326_v9 = vpop.f32.mrf.mxu0 }
 0x138   :  { %v1072_v15 = vpop.f32.mrf.mxu1 }
 0x139   :  { %v1073_v17 = vadd.f32 %v1072_v15, %v997_v14 }
 0x13a   :  { %v1339_v18 = vpop.f32.mrf.mxu1 }
 0x13b   :  { %v1076_v21 = vand.u32 2147483647, %v1073_v17 }
 0x13d   :  { %v1077_v23 = vmul.f32 2.0, %v1076_v21 }
 0x13f   :  { %v1078_v24 = vsub.f32 %v571_v22, %v1077_v23 }
 0x141   :  { %v1081_v25 = vsel %vm64_vm3, %v1078_v24, 0.0 }
 0x142   :  { %v1083_v26 = vsel %vm1082_vm4, %v1081_v25, 0.0 }
 0x143   :  { %1084 = vadd.xlane.f32.xlu0 %v1083_v26 }
 0x1cc   :  { %v1085_v27 = vpop.xlane.xlu0 %1084 }
 0x1cd   :  { %v1086_v28 = vrot.slane %v1085_v27, 4 }
 0x1cf   :  { %v1087_v29 = vadd.f32 %v1086_v28, %v1085_v27 }
 0x1d1   :  { %v1088_v30 = vrot.slane %v1087_v29, 2 }
 0x1d3   :  { %v1089_v31 = vadd.f32 %v1088_v30, %v1087_v29 }
 0x1d5   :  { %v1090_v32 = vrot.slane %v1089_v31, 1 }
 0x1d7   :  { %v1091_v33 = vadd.f32 %v1090_v32, %v1089_v31 }
 0x1d9   :  { %1340 = vpush %v1091_v33 }
 0x20a   :  { %s1341_s28 = spop %1340 }
 0x20b   :  { %v1093_v34 = vstv %s1341_s28 }
 0x20c   :  { %1095 = vst.msk [vmem:[#allocation8] sm:$0x1] %vm1094_vm5, %v1093_v34 }
 0x20d   :  { %1421 = shalt.err (!%p1418_p5)
}
 0x20e   :  { %1105 = dma.vmem_to_hbm [thread:$0]  %s1103_s2, 16, %s1707_s3, [#allocation4]  }
 0x20f   :  { %1434 = dma.done.wait [#allocation4], 16  }
 0x210   :  { %1435 = vsyncadd [#allocation4], 4294967280 }
 0x211   :  { %1109 = vsyncpa [#allocation3], 1 }
 0x212   :  { %1110 = vsyncpa [#allocation6], 1 }
 0x213   :  { %1111 = vsyncpa [#allocation4], 1 }

</bundles_post_ra>
